<compile_context>
chip_gen: v7x
topology: tpu7x:2x2x1
jax: 0.10.0
libtpu: 0.0.40
codegen_flags: <defaults>
</compile_context>

<pallas_src>
import jax
import jax.numpy as jnp
from jax.experimental import pallas as pl
from jax.experimental.pallas import tpu as pltpu


# --------------------------------------------------------------------------- kernel ---


def _ikeypoint_head_kernel(x_ref, w_ref, b_ref, out_ref):
    """Fused (folded) det+kpt head on one (C, TL) activation tile.

    x_ref  : (C, TL)        activation tile (rows = input channels, lanes = spatial)
    w_ref  : (Dd+Dk, C)     combined weight (ImplicitM folded into det rows)
    b_ref  : (Dd+Dk, 1)     combined bias  (ImplicitA / ImplicitM folded in), f32
    out_ref: (Dd+Dk, TL)    det rows followed by kpt rows (lane-dense store)
    """
    acc = jnp.dot(w_ref[...], x_ref[...], preferred_element_type=jnp.float32)
    out_ref[...] = (acc + b_ref[...]).astype(out_ref.dtype)


def _choose_lane_tile(hw, c, d_out, itemsize, budget_bytes):
    """Pick a spatial (lane) tile: a multiple of 128 sized against the VMEM budget."""
    if hw % 128 != 0:
        # Lane blocks must be multiples of 128 or the full extent; small / ragged
        # detection-head maps (e.g. 20x20=400) just use the full spatial extent.
        return hw
    # Live VMEM per lane: x tile + out tile, each double-buffered by the pipeline.
    per_lane = 2 * (c + d_out) * itemsize
    max_lanes = max(128, budget_bytes // per_lane)
    return int(max(128, min(hw, (max_lanes // 128) * 128)))


# -------------------------------------------------------------------------- wrappers ---


def ikeypoint_level_forward(x, p, *, na, no_det, no_kpt,
                            vmem_budget_bytes=12 * 1024 * 1024):
    """One IKeypoint level (training mode). Returns (N, na, H, W, no)."""
    N, C, H, W = x.shape
    dd = p["wd"].shape[0]
    dk = p["wk"].shape[0]
    assert dd == na * no_det and dk == na * no_kpt
    HW = H * W
    dtot = dd + dk
    dtype = x.dtype

    # --- trace-time folding of implicit params / biases (tiny tensors, exact algebra) ---
    #   im * (W_d @ (x + ia) + b_d) == (im * W_d) @ x + im * (W_d @ ia + b_d)
    wd_eff = p["im"].reshape(dd, 1) * p["wd"]                       # (dd, C)
    bd_eff = p["im"] * (p["wd"] @ p["ia"] + p["bd"])                # (dd,)
    w = jnp.concatenate([wd_eff, p["wk"]], axis=0).astype(dtype)    # (dd+dk, C)
    b = jnp.concatenate([bd_eff, p["bk"]], axis=0).reshape(dtot, 1).astype(jnp.float32)

    # Glue (plain JAX): flatten spatial onto the lane axis (free, contiguous reshape).
    x2 = x.reshape(N, C, HW)

    tl = _choose_lane_tile(HW, C, dtot, x.dtype.itemsize, vmem_budget_bytes)
    grid = (N, pl.cdiv(HW, tl))

    out2 = pl.pallas_call(
        _ikeypoint_head_kernel,
        out_shape=jax.ShapeDtypeStruct((N, dtot, HW), dtype),
        grid_spec=pltpu.PrefetchScalarGridSpec(
            num_scalar_prefetch=0,
            grid=grid,
            in_specs=[
                pl.BlockSpec((None, C, tl), lambda n, j: (n, 0, j)),   # x tile
                pl.BlockSpec((dtot, C), lambda n, j: (0, 0)),          # combined W (resident)
                pl.BlockSpec((dtot, 1), lambda n, j: (0, 0)),          # combined b (resident)
            ],
            out_specs=pl.BlockSpec((None, dtot, tl), lambda n, j: (n, 0, j)),
        ),
        compiler_params=pltpu.CompilerParams(
            # Both grid axes are independent -> shardable across v7x's two TensorCores.
            dimension_semantics=("parallel", "parallel"),
            # Above the default scoped limit so larger lane tiles keep full
            # double-buffering; still comfortably below v7x's 64 MiB physical VMEM.
            vmem_limit_bytes=40 * 1024 * 1024,
        ),
    )(x2, w, b)

    # Layout plumbing (plain JAX): split the fused det|kpt channels into (na, no) and move
    # `no` last — exactly torch.cat(...).view(bs, na, no, ny, nx).permute(0, 1, 3, 4, 2).
    no = no_det + no_kpt
    return out2.reshape(N, na, no, H, W).transpose(0, 1, 3, 4, 2)


def ikeypoint_forward(xs, params, *, na, no_det, no_kpt):
    """Training-mode IKeypoint.forward: list of per-level (N, na, H, W, no) tensors."""
    # TODO(synk): inference-time decode (sigmoid + grid/anchor_grid/stride scaling) is not
    # implemented; it is unreachable in the reference module as given (stride=None).
    return [ikeypoint_level_forward(x, p, na=na, no_det=no_det, no_kpt=no_kpt)
            for x, p in zip(xs, params)]


def init_ikeypoint_params(key, *, nc, anchors, nkpt, ch, dtype=jnp.float32):
    """Per-level params mirroring IKeypoint: ImplicitA, 1x1 det conv, ImplicitM, 1x1 kpt conv."""
    na = len(anchors[0]) // 2
    no_det = nc + 5
    no_kpt = 3 * nkpt
    dd, dk = no_det * na, no_kpt * na
    params = []
    for c in ch:
        key, k_ia, k_wd, k_bd, k_im, k_wk, k_bk = jax.random.split(key, 7)
        params.append(dict(
            ia=0.0 + 0.02 * jax.random.normal(k_ia, (c,), dtype),      # ImplicitA (1,C,1,1)
            wd=0.1 * jax.random.normal(k_wd, (dd, c), dtype),          # det 1x1 conv weight
            bd=0.1 * jax.random.normal(k_bd, (dd,), dtype),
            im=1.0 + 0.02 * jax.random.normal(k_im, (dd,), dtype),     # ImplicitM (1,Dd,1,1)
            wk=0.1 * jax.random.normal(k_wk, (dk, c), dtype),          # kpt 1x1 conv weight
            bk=0.1 * jax.random.normal(k_bk, (dk,), dtype),
        ))
    # TODO(synk): dw_conv_kpt=True branch (DWConv/Conv tower for m_kpt) is not implemented;
    # the default dw_conv_kpt=False plain 1x1 kpt conv is what the kernel fuses.
    return params


# ------------------------------------------------------------------------- reference ---


def _reference_level(x, p, *, na, no_det, no_kpt):
    """Plain-JAX reference with the same (unfolded) semantics as the PyTorch module."""
    N, C, H, W = x.shape
    xa = x + p["ia"].reshape(1, C, 1, 1)
    det = jnp.einsum("oc,nchw->nohw", p["wd"], xa) + p["bd"].reshape(1, -1, 1, 1)
    det = det * p["im"].reshape(1, -1, 1, 1)
    kpt = jnp.einsum("oc,nchw->nohw", p["wk"], x) + p["bk"].reshape(1, -1, 1, 1)
    y = jnp.concatenate([det, kpt], axis=1)
    no = no_det + no_kpt
    return y.reshape(N, na, no, H, W).transpose(0, 1, 3, 4, 2)


# ------------------------------------------------------------------------------ main ---


if __name__ == "__main__":
    key = jax.random.PRNGKey(0)
    k_params, k_x0, k_x1 = jax.random.split(key, 3)

    # Small IKeypoint config: 2 levels, 3 anchors, nc=4, nkpt=3.
    nc, nkpt = 4, 3
    anchors = ((10, 13, 16, 30, 33, 23), (30, 61, 62, 45, 59, 119))
    ch = (4, 8)
    na = len(anchors[0]) // 2            # 3
    no_det, no_kpt = nc + 5, 3 * nkpt    # 9, 9
    no = no_det + no_kpt                 # 18

    xs = [
        jax.random.normal(k_x0, (2, ch[0], 16, 16), jnp.float32),
        jax.random.normal(k_x1, (2, ch[1], 8, 8), jnp.float32),
    ]
    params = init_ikeypoint_params(k_params, nc=nc, anchors=anchors, nkpt=nkpt, ch=ch)

    outs = ikeypoint_forward(xs, params, na=na, no_det=no_det, no_kpt=no_kpt)
    outs = jax.block_until_ready(outs)

    for x, p, out in zip(xs, params, outs):
        N, _, H, W = x.shape
        ref = _reference_level(x, p, na=na, no_det=no_det, no_kpt=no_kpt)
        assert out.shape == (N, na, H, W, no)
        assert out.dtype == x.dtype
        # Tolerance covers MXU default-precision f32 matmul + trace-time bias folding
        # vs the unfolded XLA einsum reference.
        assert jnp.allclose(out, ref, atol=1e-2, rtol=1e-2), \
            float(jnp.max(jnp.abs(out - ref)))

    print("KERNEL_OK")
</pallas_src>

<mosaic_0001>
module attributes {stable_mosaic.version = 11 : i64} {
  func.func @_ikeypoint_head_kernel(%arg0: i32, %arg1: i32, %arg2: memref<1x4x256xf32, #tpu.memory_space<vmem>>, %arg3: memref<54x4xf32, #tpu.memory_space<vmem>>, %arg4: memref<54x1xf32, #tpu.memory_space<vmem>>, %arg5: memref<1x54x256xf32, #tpu.memory_space<vmem>>) attributes {dimension_semantics = [#tpu.dimension_semantics<parallel>, #tpu.dimension_semantics<parallel>], iteration_bounds = array<i64: 2, 1>, scalar_prefetch = 0 : i64, scratch_operands = 0 : i64, tpu.core_type = #tpu.core_type<tc>, window_params = [{transform_indices = @transform_0, window_bounds = array<i64: 1, 4, 256>}, {pipeline_mode = #tpu.pipeline_mode<synchronous>, transform_indices = @transform_1, window_bounds = array<i64: 54, 4>}, {pipeline_mode = #tpu.pipeline_mode<synchronous>, transform_indices = @transform_2, window_bounds = array<i64: 54, 1>}, {transform_indices = @transform_3, window_bounds = array<i64: 1, 54, 256>}]} {
    %c0 = arith.constant 0 : index
    %c0_0 = arith.constant 0 : index
    %0 = vector.load %arg3[%c0, %c0_0] : memref<54x4xf32, #tpu.memory_space<vmem>>, vector<54x4xf32>
    %c0_1 = arith.constant 0 : index
    %c0_2 = arith.constant 0 : index
    %c0_3 = arith.constant 0 : index
    %1 = vector.load %arg2[%c0_1, %c0_2, %c0_3] : memref<1x4x256xf32, #tpu.memory_space<vmem>>, vector<1x4x256xf32>
    %2 = vector.shape_cast %1 : vector<1x4x256xf32> to vector<4x256xf32>
    %cst = arith.constant dense<0.000000e+00> : vector<54x256xf32>
    %3 = tpu.matmul %0, %2, %cst {dimension_numbers = #tpu.dot_dimension_numbers<[1], [0], [0], [1], [0, 0, 1, 1], [], []>} : vector<54x4xf32>, vector<4x256xf32>, vector<54x256xf32> -> vector<54x256xf32>
    %c0_4 = arith.constant 0 : index
    %c0_5 = arith.constant 0 : index
    %4 = vector.load %arg4[%c0_4, %c0_5] : memref<54x1xf32, #tpu.memory_space<vmem>>, vector<54x1xf32>
    %5 = vector.broadcast %4 : vector<54x1xf32> to vector<54x256xf32>
    %6 = arith.addf %3, %5 : vector<54x256xf32>
    %c0_6 = arith.constant 0 : index
    %c0_7 = arith.constant 0 : index
    %c0_8 = arith.constant 0 : index
    %7 = vector.load %arg5[%c0_6, %c0_7, %c0_8] : memref<1x54x256xf32, #tpu.memory_space<vmem>>, vector<1x54x256xf32>
    %8 = vector.shape_cast %7 : vector<1x54x256xf32> to vector<54x256xf32>
    %9 = vector.shape_cast %6 : vector<54x256xf32> to vector<1x54x256xf32>
    tpu.vector_store %arg5[%c0_6, %c0_7, %c0_8], %9 {strides = array<i32>} : memref<1x54x256xf32, #tpu.memory_space<vmem>>, vector<1x54x256xf32>,
    return
  }
  func.func @transform_0(%arg0: i32, %arg1: i32) -> (i32, i32, i32) {
    %c0_i32 = arith.constant 0 : i32
    %c0_i32_0 = arith.constant 0 : i32
    return %arg0, %c0_i32, %arg1 : i32, i32, i32
  }
  func.func @transform_1(%arg0: i32, %arg1: i32) -> (i32, i32) {
    %c0_i32 = arith.constant 0 : i32
    %c0_i32_0 = arith.constant 0 : i32
    %c0_i32_1 = arith.constant 0 : i32
    return %c0_i32, %c0_i32_0 : i32, i32
  }
  func.func @transform_2(%arg0: i32, %arg1: i32) -> (i32, i32) {
    %c0_i32 = arith.constant 0 : i32
    %c0_i32_0 = arith.constant 0 : i32
    %c0_i32_1 = arith.constant 0 : i32
    return %c0_i32, %c0_i32_0 : i32, i32
  }
  func.func @transform_3(%arg0: i32, %arg1: i32) -> (i32, i32, i32) {
    %c0_i32 = arith.constant 0 : i32
    %c0_i32_0 = arith.constant 0 : i32
    return %arg0, %c0_i32, %arg1 : i32, i32, i32
  }
}

</mosaic_0001>

<bundles_post_ra>
// kernel: tpu_custom_call.1
= control target key start
LH: loop header
LB: loop body
LE: loop exit
PB: predicated region body
PF: predicated region fallthrough
CT: control target
= control target key end

     0   :  { %s595_s12 = smov 0   ;;  %s597_s13 = smov 0   ;;  %s697_s0 = inlined_call_operand.vmem [shape: f32[2,4,256], index: 0, kind: input, shape index: {}]   ;;  %s698_s1 = inlined_call_operand.vmem [shape: f32[54,4], index: 1, kind: input, shape index: {}]   ;;  %s699_s2 = inlined_call_operand.vmem [shape: f32[54,1], index: 2, kind: input, shape index: {}]   ;;  %s700_s3 = inlined_call_operand.vmem [shape: f32[2,54,256], index: 3, kind: output, shape index: {}]  }
   0x1   :  { %s599_s14 = smov 0  }
   0x2 LB: > { %s25_s15 = sadd.s32 1, %s567_s13  ;;  %p501_p0 = scmp.ge.s32.totalorder %s571_s14, 1  ;;  %s571_s14 = sphi %s599_s14, %s13_s14   ;;  %s567_s13 = sphi %s597_s13, %s702_s13   ;;  %s563_s12 = sphi %s595_s12, %s701_s12  }
   0x3   : > { %p27_p1 = scmp.ge.s32.totalorder %s25_s15, 2  ;;  %p158_p2 = scmp.lt.s32.totalorder %s571_s14, 3 }
   0x5   : > { %s704_s15 = smov (%p27_p1, %s25_s15), 0  ;;  %p159_p3 = pnand %p501_p0, %p158_p2 }
   0x6   : > { %p191_p4 = scmp.lt.s32.totalorder (!%p159_p3), %s563_s12, 1  ;;  %v573_v0 = vmov (!%p159_p3), 0.0   ;;  %v574_v1 = vmov (!%p159_p3), 0   ;;  %v218_v2 = vld [vmem:[%s699_s2] sm:$0xff] (!%p159_p3)  ;;  %v220_v3 = vld [vmem:[%s699_s2 + $0x10] sm:$0xff] (!%p159_p3)  ;;  %v219_v4 = vld [vmem:[%s699_s2 + $0x8] sm:$0xff] (!%p159_p3) }
   0x7   : > { %162 = sbr.rel (%p159_p3) target bundleno = 250 (0xfa), region = 32  ;;  %353 = vmatprep.mubr.f32.mxu0 (!%p159_p3), %v573_v0  ;;  %377 = vmatprep.mubr.f32.mxu1 (!%p159_p3), %v573_v0  ;;  %v221_v5 = vld [vmem:[%s699_s2 + $0x18] sm:$0xff] (!%p159_p3)  ;;  %vm284_vm0 = vcmask (!%p159_p3), 1043456   ;;  %v210_v8 = vld [vmem:[%s698_s1] sm:$0xff] (!%p159_p3)  ;;  %vm262_vm1 = vcmask (!%p159_p3), 31744   ;;  %v223_v11 = vld [vmem:[%s699_s2 + $0x28] sm:$0xff] (!%p159_p3) }
   0x8   : > { %546 = vset.pattern.permute.xlu0 (!%p159_p3), %v574_v1  ;;  %547 = vset.pattern.permute.xlu1 (!%p159_p3), %v574_v1  ;;  %v214_v9 = vld [vmem:[%s698_s1 + $0x20] sm:$0xff] (!%p159_p3)  ;;  %v211_v12 = vld [vmem:[%s698_s1 + $0x8] sm:$0xff] (!%p159_p3)  ;;  %v224_v14 = vld [vmem:[%s699_s2 + $0x30] sm:$0x3f] (!%p159_p3) }
   0x9   : > { %227 = vperm.xlu0 (!%p159_p3), %546, %v218_v2   ;;  %237 = vperm.xlu1 (!%p159_p3), %547, %v220_v3   ;;  %v222_v10 = vld [vmem:[%s699_s2 + $0x20] sm:$0xff] (!%p159_p3)  ;;  %v215_v13 = vld [vmem:[%s698_s1 + $0x28] sm:$0xff] (!%p159_p3)  ;;  %v212_v15 = vld [vmem:[%s698_s1 + $0x10] sm:$0xff] (!%p159_p3) }
   0xa   : > { %v216_v16 = vld [vmem:[%s698_s1 + $0x30] sm:$0x3f] (!%p159_p3)  ;;  %v213_v17 = vld [vmem:[%s698_s1 + $0x18] sm:$0xff] (!%p159_p3) }
   0xd   : > { %232 = vperm.xlu0 (!%p159_p3), %546, %v219_v4   ;;  %242 = vperm.xlu1 (!%p159_p3), %547, %v221_v5  }
   0xe   : > { %s706_s12 = smov (!%p191_p4, %s563_s12), 1 }
   0xf   : > { %s516_s20 = sshll.u32 %s706_s12, 3 }
  0x10   : > { %s198_s25 = scalar_lea.vmem %s697_s0, %s516_s20 }
  0x11   : > { %v217_v6 = vld [vmem:[%s198_s25] sm:$0xff]  ;;  %247 = vperm.xlu0 %546, %v222_v10   ;;  %252 = vperm.xlu1 %547, %v223_v11   ;;  %s519_s25 = smul.u32 112, %s706_s12 }
  0x12   : > { %v261_v7 = vcombine.high %v217_v6, %v217_v6 }
  0x13   : > { %s672_s28 = scalar_lea.vmem %s700_s3, %s519_s25 }
  0x14   : > { %505 = vmatprep.subr.msk.mxu0 %vm284_vm0, %v261_v7  ;;  %517 = vmatprep.subr.msk.mxu1 %vm284_vm0, %v261_v7 }
  0x15   : > { %506 = vmatpush1.msk.msra.mxu0 %vm284_vm0, %v217_v6  ;;  %518 = vmatpush1.msk.msra.mxu1 %vm284_vm0, %v217_v6 }
  0x16   : > { %507 = vmatmul.mubr.msk.f32.vlgmr.msra.gmra.mrb[0].mxu0 %vm262_vm1, %v210_v8  ;;  %511 = vmatmul.mubr.msk.f32.vlgmr.msra.gmra.mrb[0].mxu1 %vm262_vm1, %v214_v9 }
  0x17   : > { %359 = vmatprep.mubr.f32.mxu0 %v573_v0  ;;  %383 = vmatprep.mubr.f32.mxu1 %v573_v0 }
  0x18   : > { %257 = vperm.xlu0 %546, %v224_v14  }
  0x1a   : > { %508 = vmatmul.mubr.msk.f32.gmra.mrb[2].mxu0 %vm262_vm1, %v211_v12  ;;  %512 = vmatmul.mubr.msk.f32.gmra.mrb[2].mxu1 %vm262_vm1, %v215_v13 }
  0x1b   : > { %365 = vmatprep.mubr.f32.mxu0 %v573_v0  ;;  %389 = vmatprep.mubr.f32.mxu1 %v573_v0 }
  0x1e   : > { %509 = vmatmul.mubr.msk.f32.gmra.mrb[4].mxu0 %vm262_vm1, %v212_v15  ;;  %513 = vmatmul.mubr.msk.f32.gmra.mrb[4].mxu1 %vm262_vm1, %v216_v16 }
  0x1f   : > { %371 = vmatprep.mubr.f32.mxu0 %v573_v0 }
  0x22   : > { %510 = vmatmul.mubr.msk.f32.gmra.mrb[6].mxu0 %vm262_vm1, %v213_v17 }
  0x88   : > { %v228_v18 = vpop.permute.xlu0 %227  ;;  %v238_v19 = vpop.permute.xlu1 %237 }
  0x8c   : > { %v233_v20 = vpop.permute.xlu0 %232  ;;  %v243_v21 = vpop.permute.xlu1 %242 }
  0x90   : > { %v248_v22 = vpop.permute.xlu0 %247  ;;  %v253_v31 = vpop.permute.xlu1 %252 }
  0x97   : > { %v258_v40 = vpop.permute.xlu0 %257 }
  0xe9   : > { %v355_v23 = vpop.f32.mrb[0].mxu0  ;;  %v379_v24 = vpop.f32.mrb[0].mxu1 }
  0xea   : > { %v356_v25 = vadd.f32 %v355_v23, %v228_v18  ;;  %v380_v26 = vadd.f32 %v379_v24, %v248_v22  ;;  %v357_v27 = vpop.f32.mrb[1].mxu0  ;;  %v381_v28 = vpop.f32.mrb[1].mxu1 }
  0xeb   : > { %v358_v29 = vadd.f32 %v357_v27, %v228_v18  ;;  %v382_v30 = vadd.f32 %v381_v28, %v248_v22 }
  0xec   : > { %396 = vst [vmem:[%s672_s28] sm:$0xff] %v356_v25  ;;  %404 = vst [vmem:[%s672_s28 + $0x40] sm:$0xff] %v380_v26 }
  0xed   : > { %397 = vst [vmem:[%s672_s28 + $0x8] sm:$0xff] %v358_v29  ;;  %405 = vst [vmem:[%s672_s28 + $0x48] sm:$0xff] %v382_v30  ;;  %v361_v32 = vpop.f32.mrb[2].mxu0  ;;  %v385_v33 = vpop.f32.mrb[2].mxu1 }
  0xee   : > { %v362_v34 = vadd.f32 %v361_v32, %v233_v20  ;;  %v386_v35 = vadd.f32 %v385_v33, %v253_v31  ;;  %v363_v36 = vpop.f32.mrb[3].mxu0  ;;  %v387_v37 = vpop.f32.mrb[3].mxu1 }
  0xef   : > { %v364_v38 = vadd.f32 %v363_v36, %v233_v20  ;;  %v388_v39 = vadd.f32 %v387_v37, %v253_v31 }
  0xf0   : > { %398 = vst [vmem:[%s672_s28 + $0x10] sm:$0xff] %v362_v34  ;;  %406 = vst [vmem:[%s672_s28 + $0x50] sm:$0xff] %v386_v35 }
  0xf1   : > { %399 = vst [vmem:[%s672_s28 + $0x18] sm:$0xff] %v364_v38  ;;  %407 = vst [vmem:[%s672_s28 + $0x58] sm:$0xff] %v388_v39  ;;  %v367_v41 = vpop.f32.mrb[4].mxu0  ;;  %v391_v42 = vpop.f32.mrb[4].mxu1 }
  0xf2   : > { %v368_v43 = vadd.f32 %v367_v41, %v238_v19  ;;  %v392_v44 = vadd.f32 %v391_v42, %v258_v40  ;;  %v369_v45 = vpop.f32.mrb[5].mxu0  ;;  %v393_v46 = vpop.f32.mrb[5].mxu1 }
  0xf3   : > { %v370_v47 = vadd.f32 %v369_v45, %v238_v19  ;;  %v394_v48 = vadd.f32 %v393_v46, %v258_v40 }
  0xf4   : > { %400 = vst [vmem:[%s672_s28 + $0x20] sm:$0xff] %v368_v43  ;;  %408 = vst [vmem:[%s672_s28 + $0x60] sm:$0x3f] %v392_v44 }
  0xf5   : > { %401 = vst [vmem:[%s672_s28 + $0x28] sm:$0xff] %v370_v47  ;;  %409 = vst [vmem:[%s672_s28 + $0x68] sm:$0x3f] %v394_v48  ;;  %v373_v49 = vpop.f32.mrb[6].mxu0 }
  0xf6   : > { %v374_v50 = vadd.f32 %v373_v49, %v243_v21  ;;  %v375_v51 = vpop.f32.mrb[7].mxu0 }
  0xf7   : > { %v376_v52 = vadd.f32 %v375_v51, %v243_v21 }
  0xf8   : > { %402 = vst [vmem:[%s672_s28 + $0x30] sm:$0xff] %v374_v50 }
  0xf9   : > { %403 = vst [vmem:[%s672_s28 + $0x38] sm:$0xff] %v376_v52 }
  0xfa PF: > { %s13_s14 = sadd.s32 1, %s571_s14   ;;  %s701_s12 = smov %s567_s13 }
  0xfb   : > { %p10_p5 = scmp.ge.s32.totalorder %s13_s14, 4   ;;  %s702_s13 = smov %s704_s15 }
  0xfd   :  { %12 = sbr.rel (!%p10_p5) target bundleno = 2 (0x2), region = 62 }

</bundles_post_ra>
